<compile_context>
chip_gen: v6e
topology: v6e:2x2x1
jax: 0.10.0
libtpu: 0.0.40
codegen_flags: <defaults>
</compile_context>

<pallas_src>
import jax
import jax.numpy as jnp
from jax.experimental import pallas as pl
from jax.experimental.pallas import tpu as pltpu

_LANE_MAX = 1024                 # preferred lane width (multiple of 128)
_TARGET_BLOCK_BYTES = 2 << 20    # ~2 MiB per block -> ~85%+ of HBM roofline
_FLAT_BLOCK = 512 * 1024         # fallback 1-D block (elements), multiple of 128


def _norm_zero_one_kernel(min_max_ref, x_ref, o_ref):
    mn = min_max_ref[0]
    mx = min_max_ref[1]
    inv = 1.0 / (mx - mn)                         # scalar unit, once per grid step
    x = x_ref[...].astype(jnp.float32)
    o_ref[...] = ((x - mn) * inv).astype(o_ref.dtype)


def _pick_lane(n: int) -> int:
    """Largest multiple-of-128 divisor of n, capped at _LANE_MAX (requires n % 128 == 0)."""
    lane = 128
    for cand in range(256, _LANE_MAX + 1, 128):
        if n % cand == 0:
            lane = cand
    return lane


def _pick_tile_r(rows: int, lane: int, itemsize: int) -> int:
    """Rows per block: ~2 MiB per block, >= 2 grid steps whenever rows allow it."""
    if rows <= 8:
        return rows
    tile = max(8, _TARGET_BLOCK_BYTES // (lane * itemsize))
    if rows >= 16:
        tile = min(tile, pl.cdiv(rows, 2))        # give v7x's 2nd TensorCore work
    if tile >= rows:
        return rows                               # full-extent block (always legal)
    return max(8, (tile // 8) * 8)                # sublane-aligned partial tile


def norm_zero_one(x: jax.Array, min_max: jax.Array) -> jax.Array:
    """Normalise tensor to [0, 1] using values from min_max (shape (2,))."""
    orig_shape = x.shape
    in_dtype = x.dtype
    out_dtype = in_dtype if jnp.issubdtype(in_dtype, jnp.floating) else jnp.float32
    n = int(x.size)
    if n == 0:
        return x.astype(out_dtype)

    mm = jnp.asarray(min_max, dtype=jnp.float32)
    flat = x.reshape(-1)
    itemsize = max(jnp.dtype(in_dtype).itemsize, jnp.dtype(out_dtype).itemsize)

    params = pltpu.CompilerParams(dimension_semantics=("parallel",))

    if n % 128 == 0:
        # Lane-dense 2-D path: exact factoring, no padding, unmasked vst.
        lane = _pick_lane(n)
        rows = n // lane
        tile_r = _pick_tile_r(rows, lane, itemsize)
        x2 = flat.reshape(rows, lane)
        out2 = pl.pallas_call(
            _norm_zero_one_kernel,
            out_shape=jax.ShapeDtypeStruct((rows, lane), out_dtype),
            grid=(pl.cdiv(rows, tile_r),),
            in_specs=[
                pl.BlockSpec(memory_space=pltpu.MemorySpace.SMEM),   # min_max scalars
                pl.BlockSpec((tile_r, lane), lambda i: (i, 0)),
            ],
            out_specs=pl.BlockSpec((tile_r, lane), lambda i: (i, 0)),
            compiler_params=params,
        )(mm, x2)
        return out2.reshape(orig_shape)

    # Fallback (numel not a multiple of 128): 1-D grid over the flat array.
    # Pallas masks the partial last block; still no pad/slice round trips.
    block = n if n <= _FLAT_BLOCK else _FLAT_BLOCK
    out_flat = pl.pallas_call(
        _norm_zero_one_kernel,
        out_shape=jax.ShapeDtypeStruct((n,), out_dtype),
        grid=(pl.cdiv(n, block),),
        in_specs=[
            pl.BlockSpec(memory_space=pltpu.MemorySpace.SMEM),
            pl.BlockSpec((block,), lambda i: (i,)),
        ],
        out_specs=pl.BlockSpec((block,), lambda i: (i,)),
        compiler_params=params,
    )(mm, flat)
    return out_flat.reshape(orig_shape)


if __name__ == "__main__":
    key = jax.random.PRNGKey(0)
    # Example input consistent with an NCHW feature map: (batch=2, C=4, H=16, W=16)
    x = jax.random.normal(key, (2, 4, 16, 16), dtype=jnp.float32) * 5.0

    # Deterministic "buffer" init (module __init__ takes a min_max tuple).
    min_max = jnp.asarray([-10.0, 10.0], dtype=jnp.float32)

    y = norm_zero_one(x, min_max)
    jax.block_until_ready(y)

    # Reference check in plain JAX.
    y_ref = (x - min_max[0]) / (min_max[1] - min_max[0])
    assert y.shape == x.shape and y.dtype == x.dtype
    assert jnp.allclose(y, y_ref, atol=1e-6, rtol=1e-6)

    print("KERNEL_OK")
</pallas_src>

<mosaic_0001>
module attributes {stable_mosaic.version = 11 : i64} {
  func.func @_norm_zero_one_kernel(%arg0: i32, %arg1: memref<2xf32, #tpu.memory_space<smem>>, %arg2: memref<2x1024xf32, #tpu.memory_space<vmem>>, %arg3: memref<2x1024xf32, #tpu.memory_space<vmem>>) attributes {dimension_semantics = [#tpu.dimension_semantics<parallel>], iteration_bounds = array<i64: 1>, scalar_prefetch = 0 : i64, scratch_operands = 0 : i64, tpu.core_type = #tpu.core_type<tc>, window_params = [{transform_indices = @transform_0, window_bounds = array<i64: 2>}, {transform_indices = @transform_1, window_bounds = array<i64: 2, 1024>}, {transform_indices = @transform_2, window_bounds = array<i64: 2, 1024>}]} {
    %c0 = arith.constant 0 : index
    %0 = memref.load %arg1[%c0] : memref<2xf32, #tpu.memory_space<smem>>
    %c1 = arith.constant 1 : index
    %1 = memref.load %arg1[%c1] : memref<2xf32, #tpu.memory_space<smem>>
    %2 = arith.subf %1, %0 : f32
    %cst = arith.constant 1.000000e+00 : f32
    %3 = arith.divf %cst, %2 : f32
    %c0_0 = arith.constant 0 : index
    %c0_1 = arith.constant 0 : index
    %4 = vector.load %arg2[%c0_0, %c0_1] : memref<2x1024xf32, #tpu.memory_space<vmem>>, vector<2x1024xf32>
    %5 = vector.broadcast %0 : f32 to vector<2x1024xf32>
    %6 = arith.subf %4, %5 : vector<2x1024xf32>
    %7 = vector.broadcast %3 : f32 to vector<2x1024xf32>
    %8 = arith.mulf %6, %7 : vector<2x1024xf32>
    %c0_2 = arith.constant 0 : index
    %c0_3 = arith.constant 0 : index
    %9 = vector.load %arg3[%c0_2, %c0_3] : memref<2x1024xf32, #tpu.memory_space<vmem>>, vector<2x1024xf32>
    tpu.vector_store %arg3[%c0_2, %c0_3], %8 {strides = array<i32>} : memref<2x1024xf32, #tpu.memory_space<vmem>>, vector<2x1024xf32>,
    return
  }
  func.func @transform_0(%arg0: i32) -> i32 {
    %c0_i32 = arith.constant 0 : i32
    %c0_i32_0 = arith.constant 0 : i32
    return %c0_i32 : i32
  }
  func.func @transform_1(%arg0: i32) -> (i32, i32) {
    %c0_i32 = arith.constant 0 : i32
    %c0_i32_0 = arith.constant 0 : i32
    return %arg0, %c0_i32 : i32, i32
  }
  func.func @transform_2(%arg0: i32) -> (i32, i32) {
    %c0_i32 = arith.constant 0 : i32
    %c0_i32_0 = arith.constant 0 : i32
    return %arg0, %c0_i32 : i32, i32
  }
}

</mosaic_0001>

<bundles_post_ra>
// kernel: tpu_custom_call.1
= control target key start
LH: loop header
LB: loop body
LE: loop exit
PB: predicated region body
PF: predicated region fallthrough
CT: control target
= control target key end

     0   :  { %7 = vsyncpa [#allocation5], 0  ;;  %s156_s0 = inlined_call_operand.hbm [shape: f32[2], index: 0, kind: input, shape index: {}]   ;;  %s157_s1 = inlined_call_operand.hbm [shape: f32[2,1024], index: 1, kind: input, shape index: {}]   ;;  %s158_s2 = inlined_call_operand.hbm [shape: f32[2,1024], index: 2, kind: output, shape index: {}]  }
   0x1   :  { %8 = vsyncpa [#allocation3], 0 }
   0x2   :  { %9 = vsyncpa [#allocation4], 0  ;;  %s129_s9 = smov [#allocation2]   ;;  %s130_s12 = smov [#allocation6]  }
   0x3   :  { %17 = dma.hbm_to_smem %s156_s0, 16, %s129_s9, [#allocation5]  }
   0x4   :  { %s24_s13 = sshll.u32 %s130_s12, 4  ;;  %s25_s13 = int_to_ptr.vmem [resolvable:$true] %s24_s13 }
   0x5   :  { %s91_s14 = scalar_lea.vmem %s25_s13, 256  ;;  %p96_p1 = scmp.lt.s32.totalorder %s25_s13, %s25_s13 }
   0x6   :  { %p92_p0 = scmp.ne.s32.totalorder %s25_s13, %s91_s14  ;;  %p97_p2 = scmp.lt.s32.totalorder %s91_s14, %s91_s14 }
   0x8   :  { %p98_p3 = por %p97_p2, %p96_p1 }
   0xa   :  { %p99_p4 = pnand %p98_p3, %p92_p0 }
   0xc   :  { %102 = shalt.err (!%p99_p4)
}
   0xd   :  { %27 = dma.hbm_to_vmem [thread:$0]  %s157_s1, 256, %s25_s13, [#allocation3]  }
   0xe   :  { %123 = dma.done.wait [#allocation5], 16  }
   0xf   :  { %124 = vsyncadd [#allocation5], 4294967280 }
  0x10   :  { %125 = dma.done.wait [#allocation3], 256  }
  0x11   :  { %126 = vsyncadd [#allocation3], 4294967040 }
  0x12   :  { %34 = sfence }
  0x13   :  { %s35_s0 = sld [smem:[#allocation2]]  ;;  %v41_v2 = vld [vmem:[#allocation6] sm:$0xff]  ;;  %v42_v3 = vld [vmem:[#allocation6 + $0x8] sm:$0xff]  ;;  %s131_s19 = smov [#allocation7]  }
  0x14   :  { %s67_s17 = sld [smem:[#allocation2 + $0x1]]  ;;  %s57_s20 = sshll.u32 %s131_s19, 4  ;;  %s58_s20 = int_to_ptr.vmem [resolvable:$true] %s57_s20 }
  0x15   :  { %s103_s21 = scalar_lea.vmem %s58_s20, 256  ;;  %p108_p6 = scmp.lt.s32.totalorder %s58_s20, %s58_s20 }
  0x16   :  { %p104_p5 = scmp.ne.s32.totalorder %s58_s20, %s103_s21  ;;  %p109_p7 = scmp.lt.s32.totalorder %s103_s21, %s103_s21 }
  0x18   :  { %p110_p8 = por %p109_p7, %p108_p6 }
  0x19   :  { %v43_v4 = vstv %s35_s0 }
  0x1a   :  { %s37_s18 = ssub.f32 %s67_s17, %s35_s0  ;;  %v44_v5 = vsub.f32 %v41_v2, %v43_v4  ;;  %v45_v6 = vsub.f32 %v42_v3, %v43_v4  ;;  %p111_p9 = pnand %p110_p8, %p104_p5 }
  0x1c   :  { %v38_v0 = vstv %s37_s18 }
  0x1d   :  { %73 = vrcp.f32 %v38_v0 }
  0x2a   :  { %v74_v1 = vpop.eup %73 }
  0x2b   :  { %68 = vpush %v74_v1 }
  0x5c   :  { %s69_s1 = spop %68 }
  0x5d   :  { %v46_v7 = vstv %s69_s1 }
  0x5e   :  { %v47_v8 = vmul.f32 %v46_v7, %v44_v5  ;;  %v48_v9 = vmul.f32 %v46_v7, %v45_v6 }
  0x60   :  { %49 = vst [vmem:[#allocation7] sm:$0xff] %v47_v8  ;;  %50 = vst [vmem:[#allocation7 + $0x8] sm:$0xff] %v48_v9 }
  0x61   :  { %114 = shalt.err (!%p111_p9)
}
  0x62   :  { %60 = dma.vmem_to_hbm [thread:$0]  %s58_s20, 256, %s158_s2, [#allocation4]  }
  0x63   :  { %127 = dma.done.wait [#allocation4], 256  }
  0x64   :  { %128 = vsyncadd [#allocation4], 4294967040 }
  0x65   :  { %64 = vsyncpa [#allocation3], 1 }
  0x66   :  { %65 = vsyncpa [#allocation4], 1 }
  0x67   :  { %66 = vsyncpa [#allocation5], 1 }

</bundles_post_ra>
